<compile_context>
chip_gen: v7x
topology: tpu7x:2x2x1
jax: 0.10.0
libtpu: 0.0.40
codegen_flags: <defaults>
</compile_context>

<pallas_src>
import functools

import jax
import jax.numpy as jnp
from jax.experimental import pallas as pl
from jax.experimental.pallas import tpu as pltpu

_VMEM_LIMIT = 32 * 1024 * 1024      # raise v5e's 16 MiB default; <= physical on all gens
_STREAM_BUDGET = 12 * 1024 * 1024   # target for double-buffered streaming blocks


def _round_up(n: int, m: int) -> int:
    return ((n + m - 1) // m) * m


def _cdiv(a: int, b: int) -> int:
    return -(-a // b)


def _pad_lanes(n: int) -> int:
    """Pad a lane (last-dim) size to a multiple of 128 when the inflation is
    <= 2x; tiny dims are left as full-dim blocks (padding them would multiply
    the HBM traffic of this memory-bound op far more than masked stores cost)."""
    if n % 128 == 0 or n < 64:
        return n
    return _round_up(n, 128)


def _choose_tile(n_rows, bytes_per_row, *, vmem_budget, min_steps=1,
                 target_step_bytes=2 << 20, hard_max=4096):
    """Row-tile size: multiple of 8, minimal padding (cdiv-balanced), >= ~2 MiB
    streamed per grid step, double-buffered blocks within `vmem_budget`."""
    bpr = max(int(bytes_per_row), 1)
    vmem_cap = max(8, int(vmem_budget) // (2 * bpr))
    size_cap = max(512, target_step_bytes // bpr)
    tile_cap = max(8, (min(hard_max, vmem_cap, size_cap) // 8) * 8)
    steps = max(min_steps, _cdiv(n_rows, tile_cap))
    tile = min(tile_cap, _round_up(_cdiv(n_rows, steps), 8))
    return tile, _round_up(n_rows, tile)


# ---------------------------------------------------------------------------
# Kernels
# ---------------------------------------------------------------------------
def _nlinear_shared_rows_kernel(L, x_ref, wt_ref, b_ref, o_ref):
    # x_ref: (TM, Lp) f32   wt_ref: (Lp, Pp)   b_ref: (1, Pp) f32   o_ref: (TM, Pp)
    x = x_ref[...]
    last = x[:, L - 1:L]                 # true last time step (static index; L may be < Lp)
    xc = x - last                        # padded L columns become -last, but the
    w = wt_ref[...]                      # corresponding weight rows are zero.
    y = jnp.dot(xc.astype(w.dtype), w, preferred_element_type=jnp.float32)
    o_ref[...] = (y + b_ref[...] + last).astype(o_ref.dtype)


def _nlinear_shared_clane_kernel(x_ref, w_ref, b_ref, o_ref):
    # x_ref: (1, L, TC) f32   w_ref: (P, L)   b_ref: (P, 1) f32   o_ref: (1, P, TC)
    x = x_ref[0]                         # (L, TC), channels on lanes; L never padded here
    last = x[-1:, :]                     # (1, TC) true last time step
    xc = x - last
    w = w_ref[...]
    y = jnp.dot(w, xc.astype(w.dtype), preferred_element_type=jnp.float32)   # (P, TC)
    o_ref[0] = (y + b_ref[...] + last).astype(o_ref.dtype)


def _nlinear_individual_kernel(x_ref, w_ref, b_ref, o_ref):
    # x_ref: (1, TB, L) f32   w_ref: (1, L, Pp)   b_ref: (1, 1, Pp) f32   o_ref: (1, TB, Pp)
    x = x_ref[0]
    last = x[:, -1:]                     # L never padded on this path
    xc = x - last
    w = w_ref[0]                         # pre-transposed (L, Pp): plain MXU dot, no vxpose
    y = jnp.dot(xc.astype(w.dtype), w, preferred_element_type=jnp.float32)
    o_ref[0] = (y + b_ref[0] + last).astype(o_ref.dtype)


# ---------------------------------------------------------------------------
# Wrappers
# ---------------------------------------------------------------------------
@functools.partial(jax.jit, static_argnames=("use_bf16",))
def nlinear_shared(x, weight, bias, use_bf16=True):
    """Shared Linear over L.  x: (B, L, C), weight: (P, L), bias: (P,) -> (B, P, C)."""
    B, L, C = x.shape
    P = weight.shape[0]
    w_dtype = jnp.bfloat16 if use_bf16 else x.dtype
    w_bytes = jnp.dtype(w_dtype).itemsize

    if C % 128 == 0:
        # --- Channel-major fast path: no transposes, output natively (B, P, C).
        TC = max(t for t in (512, 384, 256, 128) if C % t == 0)
        w2 = weight.astype(w_dtype)                   # (P, L) resident weight
        b2 = bias.reshape(P, 1)                       # keep bias in f32
        cost = pl.CostEstimate(
            flops=2 * B * C * L * P, transcendentals=0,
            bytes_accessed=(B * L * C + B * P * C) * 4 + P * L * w_bytes)
        return pl.pallas_call(
            _nlinear_shared_clane_kernel,
            out_shape=jax.ShapeDtypeStruct((B, P, C), x.dtype),
            grid_spec=pltpu.PrefetchScalarGridSpec(
                num_scalar_prefetch=0,
                grid=(B, C // TC),
                in_specs=[
                    pl.BlockSpec((1, L, TC), lambda b, c: (b, 0, c)),
                    pl.BlockSpec((P, L), lambda b, c: (0, 0)),
                    pl.BlockSpec((P, 1), lambda b, c: (0, 0)),
                ],
                out_specs=pl.BlockSpec((1, P, TC), lambda b, c: (b, 0, c)),
            ),
            compiler_params=pltpu.CompilerParams(
                dimension_semantics=("parallel", "parallel"),
                vmem_limit_bytes=_VMEM_LIMIT),
            cost_estimate=cost,
        )(x, w2, b2)

    # --- General path: fold (B, C) into rows; lane-pad L (K dim) and P (output).
    Lp, Pp = _pad_lanes(L), _pad_lanes(P)
    R = B * C
    budget = max(2 << 20, _STREAM_BUDGET - 2 * Lp * Pp * w_bytes)
    TM, Rp = _choose_tile(R, (Lp + Pp) * 4, vmem_budget=budget, min_steps=2)

    xr = x.transpose(0, 2, 1).reshape(R, L)           # (B*C, L), L contiguous on lanes
    if Rp != R or Lp != L:
        xr = jnp.pad(xr, ((0, Rp - R), (0, Lp - L)))

    wt = weight.T                                      # (L, P)
    if Lp != L or Pp != P:
        wt = jnp.pad(wt, ((0, Lp - L), (0, Pp - P)))   # zero rows/cols keep math exact
    wt = wt.astype(w_dtype)
    b2 = (bias if Pp == P else jnp.pad(bias, (0, Pp - P))).reshape(1, Pp)

    cost = pl.CostEstimate(
        flops=2 * Rp * Lp * Pp, transcendentals=0,
        bytes_accessed=(Rp * Lp + Rp * Pp) * 4 + Lp * Pp * w_bytes)
    out = pl.pallas_call(
        functools.partial(_nlinear_shared_rows_kernel, L),
        out_shape=jax.ShapeDtypeStruct((Rp, Pp), x.dtype),
        grid_spec=pltpu.PrefetchScalarGridSpec(
            num_scalar_prefetch=0,
            grid=(Rp // TM,),
            in_specs=[
                pl.BlockSpec((TM, Lp), lambda i: (i, 0)),
                pl.BlockSpec((Lp, Pp), lambda i: (0, 0)),
                pl.BlockSpec((1, Pp), lambda i: (0, 0)),
            ],
            out_specs=pl.BlockSpec((TM, Pp), lambda i: (i, 0)),
        ),
        compiler_params=pltpu.CompilerParams(
            dimension_semantics=("parallel",),
            vmem_limit_bytes=_VMEM_LIMIT),
        cost_estimate=cost,
    )(xr, wt, b2)

    # TODO(synk): callers able to consume (B, C, P) directly should skip this
    # final transpose (one extra HBM pass on a memory-bound op).
    return out[:R, :P].reshape(B, C, P).transpose(0, 2, 1)


@functools.partial(jax.jit, static_argnames=("use_bf16",))
def nlinear_individual(x, weight, bias, use_bf16=True):
    """Per-channel Linear.  x: (B, L, C), weight: (C, P, L), bias: (C, P) -> (B, P, C)."""
    B, L, C = x.shape
    P = weight.shape[1]
    w_dtype = jnp.bfloat16 if use_bf16 else x.dtype
    w_bytes = jnp.dtype(w_dtype).itemsize
    Pp = _pad_lanes(P)

    # Parameter prep (done once at load time in a real model): (C, P, L) ->
    # (C, L, Pp) so the kernel dot has no transposed RHS, stored bf16 in HBM
    # to halve the dominant weight traffic when use_bf16.
    w_lp = weight.transpose(0, 2, 1)
    if Pp != P:
        w_lp = jnp.pad(w_lp, ((0, 0), (0, 0), (0, Pp - P)))
    w_lp = w_lp.astype(w_dtype)
    b3 = (bias if Pp == P else jnp.pad(bias, ((0, 0), (0, Pp - P)))).reshape(C, 1, Pp)

    budget = max(2 << 20, _STREAM_BUDGET - 2 * L * Pp * w_bytes)
    TB, Bp = _choose_tile(B, (L + Pp) * 4, vmem_budget=budget, min_steps=1)

    xt = x.transpose(2, 0, 1)                          # (C, B, L)
    if Bp != B:
        xt = jnp.pad(xt, ((0, 0), (0, Bp - B), (0, 0)))

    cost = pl.CostEstimate(
        flops=2 * C * Bp * L * Pp, transcendentals=0,
        bytes_accessed=(C * Bp * L + C * Bp * Pp) * 4 + C * L * Pp * w_bytes)
    out = pl.pallas_call(
        _nlinear_individual_kernel,
        out_shape=jax.ShapeDtypeStruct((C, Bp, Pp), x.dtype),
        grid_spec=pltpu.PrefetchScalarGridSpec(
            num_scalar_prefetch=0,
            # Channel axis outermost so the (L, Pp) weight block is reused
            # (not re-fetched) across the inner batch-tile axis.
            grid=(C, Bp // TB),
            in_specs=[
                pl.BlockSpec((1, TB, L), lambda c, b: (c, b, 0)),
                pl.BlockSpec((1, L, Pp), lambda c, b: (c, 0, 0)),
                pl.BlockSpec((1, 1, Pp), lambda c, b: (c, 0, 0)),
            ],
            out_specs=pl.BlockSpec((1, TB, Pp), lambda c, b: (c, b, 0)),
        ),
        compiler_params=pltpu.CompilerParams(
            dimension_semantics=("parallel", "parallel"),
            vmem_limit_bytes=_VMEM_LIMIT),
        cost_estimate=cost,
    )(xt, w_lp, b3)

    # TODO(synk): callers able to consume (C, B, P) directly should skip this
    # final transpose.
    return out[:, :B, :P].transpose(1, 2, 0)


# ---------------------------------------------------------------------------
# Pure-JAX references (correctness checks)
# ---------------------------------------------------------------------------
def _ref_shared(x, weight, bias):
    seq_last = x[:, -1:, :]
    xc = x - seq_last
    y = jnp.einsum("blc,pl->bpc", xc, weight) + bias[None, :, None]
    return y + seq_last


def _ref_individual(x, weight, bias):
    seq_last = x[:, -1:, :]
    xc = x - seq_last
    y = jnp.einsum("blc,cpl->bpc", xc, weight) + bias.T[None, :, :]
    return y + seq_last


def _ref_shared_bf16(x, weight, bias):
    seq_last = x[:, -1:, :]
    xc = (x - seq_last).astype(jnp.bfloat16)
    y = jnp.einsum("blc,pl->bpc", xc, weight.astype(jnp.bfloat16),
                   preferred_element_type=jnp.float32)
    return y + bias[None, :, None] + seq_last


def _ref_individual_bf16(x, weight, bias):
    seq_last = x[:, -1:, :]
    xc = (x - seq_last).astype(jnp.bfloat16)
    y = jnp.einsum("blc,cpl->bpc", xc, weight.astype(jnp.bfloat16),
                   preferred_element_type=jnp.float32)
    return y + bias.T[None, :, :] + seq_last


# ---------------------------------------------------------------------------
def _check(name, out, ref, atol, rtol):
    assert out.shape == ref.shape, (name, out.shape, ref.shape)
    ok = bool(jnp.allclose(out, ref, atol=atol, rtol=rtol))
    assert ok, (name, float(jnp.max(jnp.abs(out - ref))))


def _run_case(key, B, L, P, C):
    kx, kw, kb, kwi, kbi = jax.random.split(key, 5)
    x = jax.random.normal(kx, (B, L, C), dtype=jnp.float32)
    bound = 1.0 / (L ** 0.5)
    w_s = jax.random.uniform(kw, (P, L), jnp.float32, -bound, bound)
    b_s = jax.random.uniform(kb, (P,), jnp.float32, -bound, bound)
    w_i = jax.random.uniform(kwi, (C, P, L), jnp.float32, -bound, bound)
    b_i = jax.random.uniform(kbi, (C, P), jnp.float32, -bound, bound)

    # Exact f32 parity with the PyTorch module.
    out = jax.block_until_ready(nlinear_shared(x, w_s, b_s, use_bf16=False))
    _check("shared_f32", out, _ref_shared(x, w_s, b_s), 1e-3, 1e-3)
    out = jax.block_until_ready(nlinear_individual(x, w_i, b_i, use_bf16=False))
    _check("individual_f32", out, _ref_individual(x, w_i, b_i), 1e-3, 1e-3)

    # Default bf16-operand / f32-accumulate fast path.
    out = jax.block_until_ready(nlinear_shared(x, w_s, b_s))
    _check("shared_bf16", out, _ref_shared_bf16(x, w_s, b_s), 2e-3, 2e-3)
    out = jax.block_until_ready(nlinear_individual(x, w_i, b_i))
    _check("individual_bf16", out, _ref_individual_bf16(x, w_i, b_i), 2e-3, 2e-3)


if __name__ == "__main__":
    key = jax.random.PRNGKey(0)
    k1, k2, k3, k4 = jax.random.split(key, 4)

    # Module-consistent small shapes: batch=2, seq_len=8, pred_len=4, channels=4.
    _run_case(k1, B=2, L=8, P=4, C=4)
    # Awkward (non-multiple-of-8) shapes: padding / tiling edge cases.
    _run_case(k2, B=3, L=24, P=12, C=7)
    # Realistic seq/pred lengths: exercises the L/P lane-padding (128) path.
    _run_case(k3, B=2, L=96, P=96, C=5)
    # Channel count that is a multiple of 128: exercises the transpose-free
    # channel-major shared path.
    _run_case(k4, B=2, L=48, P=40, C=128)

    print("KERNEL_OK")
</pallas_src>

<mosaic_0001>
module attributes {stable_mosaic.version = 11 : i64} {
  func.func @_nlinear_shared_rows_kernel(%arg0: i32, %arg1: memref<8x8xf32, #tpu.memory_space<vmem>>, %arg2: memref<8x4xf32, #tpu.memory_space<vmem>>, %arg3: memref<1x4xf32, #tpu.memory_space<vmem>>, %arg4: memref<8x4xf32, #tpu.memory_space<vmem>>) attributes {dimension_semantics = [#tpu.dimension_semantics<parallel>], iteration_bounds = array<i64: 1>, scalar_prefetch = 0 : i64, scratch_operands = 0 : i64, tpu.core_type = #tpu.core_type<tc>, window_params = [{transform_indices = @transform_0, window_bounds = array<i64: 8, 8>}, {pipeline_mode = #tpu.pipeline_mode<synchronous>, transform_indices = @transform_1, window_bounds = array<i64: 8, 4>}, {pipeline_mode = #tpu.pipeline_mode<synchronous>, transform_indices = @transform_2, window_bounds = array<i64: 1, 4>}, {transform_indices = @transform_3, window_bounds = array<i64: 8, 4>}]} {
    %c0 = arith.constant 0 : index
    %c0_0 = arith.constant 0 : index
    %0 = vector.load %arg1[%c0, %c0_0] : memref<8x8xf32, #tpu.memory_space<vmem>>, vector<8x8xf32>
    %1 = vector.extract_strided_slice %0 {offsets = [0, 7], sizes = [8, 1], strides = [1, 1]} : vector<8x8xf32> to vector<8x1xf32>
    %2 = vector.broadcast %1 : vector<8x1xf32> to vector<8x8xf32>
    %3 = arith.subf %0, %2 : vector<8x8xf32>
    %c0_1 = arith.constant 0 : index
    %c0_2 = arith.constant 0 : index
    %4 = vector.load %arg2[%c0_1, %c0_2] : memref<8x4xf32, #tpu.memory_space<vmem>>, vector<8x4xf32>
    %cst = arith.constant dense<0.000000e+00> : vector<8x4xf32>
    %5 = tpu.matmul %3, %4, %cst {dimension_numbers = #tpu.dot_dimension_numbers<[1], [0], [0], [1], [0, 0, 1, 1], [], []>} : vector<8x8xf32>, vector<8x4xf32>, vector<8x4xf32> -> vector<8x4xf32>
    %c0_3 = arith.constant 0 : index
    %c0_4 = arith.constant 0 : index
    %6 = vector.load %arg3[%c0_3, %c0_4] : memref<1x4xf32, #tpu.memory_space<vmem>>, vector<1x4xf32>
    %7 = vector.broadcast %6 : vector<1x4xf32> to vector<8x4xf32>
    %8 = arith.addf %5, %7 : vector<8x4xf32>
    %9 = vector.broadcast %1 : vector<8x1xf32> to vector<8x4xf32>
    %10 = arith.addf %8, %9 : vector<8x4xf32>
    %c0_5 = arith.constant 0 : index
    %c0_6 = arith.constant 0 : index
    %11 = vector.load %arg4[%c0_5, %c0_6] : memref<8x4xf32, #tpu.memory_space<vmem>>, vector<8x4xf32>
    tpu.vector_store %arg4[%c0_5, %c0_6], %10 {strides = array<i32>} : memref<8x4xf32, #tpu.memory_space<vmem>>, vector<8x4xf32>,
    return
  }
  func.func @transform_0(%arg0: i32) -> (i32, i32) {
    %c0_i32 = arith.constant 0 : i32
    %c0_i32_0 = arith.constant 0 : i32
    return %arg0, %c0_i32 : i32, i32
  }
  func.func @transform_1(%arg0: i32) -> (i32, i32) {
    %c0_i32 = arith.constant 0 : i32
    %c0_i32_0 = arith.constant 0 : i32
    %c0_i32_1 = arith.constant 0 : i32
    return %c0_i32, %c0_i32_0 : i32, i32
  }
  func.func @transform_2(%arg0: i32) -> (i32, i32) {
    %c0_i32 = arith.constant 0 : i32
    %c0_i32_0 = arith.constant 0 : i32
    %c0_i32_1 = arith.constant 0 : i32
    return %c0_i32, %c0_i32_0 : i32, i32
  }
  func.func @transform_3(%arg0: i32) -> (i32, i32) {
    %c0_i32 = arith.constant 0 : i32
    %c0_i32_0 = arith.constant 0 : i32
    return %arg0, %c0_i32 : i32, i32
  }
}

</mosaic_0001>

<bundles_post_ra>
// kernel: nlinear_shared.1
= control target key start
LH: loop header
LB: loop body
LE: loop exit
PB: predicated region body
PF: predicated region fallthrough
CT: control target
= control target key end

     0   :  { %v123_v0 = vmov 7   ;;  %v124_v2 = vmov 0.0   ;;  %vm125_vm0 = vmmov 0   ;;  %vm29_vm1 = vcmask 64512   ;;  %s158_s0 = inlined_call_operand.vmem [shape: f32[8,8], index: 0, kind: input, shape index: {}]   ;;  %s159_s1 = inlined_call_operand.vmem [shape: f32[8,4], index: 1, kind: input, shape index: {}]   ;;  %s160_s2 = inlined_call_operand.vmem [shape: f32[1,4], index: 2, kind: input, shape index: {}]   ;;  %s161_s3 = inlined_call_operand.vmem [shape: f32[8,4], index: 3, kind: output, shape index: {}]  }
   0x1   :  { %122 = vset.pattern.permute.xlu0 %v123_v0  ;;  %v14_v1 = vld [vmem:[%s158_s0] sm:$0xff]  ;;  %114 = vmatprep.subr.mxu0 %v124_v2  ;;  %vm104_vm2 = vcmask 31744  }
   0x2   :  { %17 = vperm.xlu0 %122, %v14_v1   ;;  %v21_v3 = vld [vmem:[%s159_s1] sm:$0xff]  ;;  %116 = vmatprep.mubr.msk.f32.mxu0 %vm125_vm0, %v124_v2 }
   0x3   :  { %115 = vmatpush3.msra.mxu0 %v21_v3  ;;  %v110_v6 = vld [vmem:[%s160_s2] ss:$0 sm:$0xff] }
  0x81   :  { %v18_v4 = vpop.permute.xlu0 %17 }
  0x82   :  { %v20_v5 = vsub.f32 %v14_v1, %v18_v4 }
  0x84   :  { %117 = vmatmul.mubr.msk.f32.vlgmr.msra.gmra.mrb[0].mxu0 %vm29_vm1, %v20_v5 }
 0x157   :  { %v99_v7 = vpop.f32.mrb[0].mxu0 }
 0x158   :  { %v100_v8 = vadd.f32 %v110_v6, %v99_v7  ;;  %v118_v9 = vpop.f32.mrb[1].mxu0 }
 0x15a   :  { %v103_v10 = vadd.f32 %v100_v8, %v18_v4 }
 0x15c   :  { %105 = vst.msk [vmem:[%s161_s3] sm:$0xff] %vm104_vm2, %v103_v10 }

</bundles_post_ra>
